<compile_context>
chip_gen: v7x
topology: tpu7x:2x2x1
jax: 0.10.0
libtpu: 0.0.40
codegen_flags: <defaults>
</compile_context>

<pallas_src>
import math

import jax
import jax.numpy as jnp
from jax.experimental import pallas as pl
from jax.experimental.pallas import tpu as pltpu

NODE_DIM = 64
EDGE_DIM = 64
HEADS = 4
HC = NODE_DIM * HEADS
LN_EPS = 1e-5
NEG_INF = -1e30


def proj_kernel(x_ref, w_ref, b_ref, o_ref):
    """One-shot packed projection: [q/sqrt(C) | skip | k | v] = x @ W_all + b_all."""
    o_ref[...] = (jnp.dot(x_ref[...], w_ref[...],
                          preferred_element_type=jnp.float32) + b_ref[...])


def unimp_attn_kernel(xres_ref, skip_ref, q_ref, qe_ref, k_ref, v_ref,
                      adj_ref, ed_ref, we_ref,
                      gamma_ref, beta_ref, wlin_ref, blin_ref,
                      out_ref,
                      m_scr, l_scr, acc_scr, racc_scr):
    f32 = jnp.float32
    j = pl.program_id(1)
    nj = pl.num_programs(1)
    H, TI, C = q_ref.shape

    @pl.when(j == 0)
    def _init():
        m_scr[...] = jnp.full_like(m_scr, NEG_INF)
        l_scr[...] = jnp.zeros_like(l_scr)
        acc_scr[...] = jnp.zeros_like(acc_scr)
        racc_scr[...] = jnp.zeros_like(racc_scr)

    q = q_ref[...]                               # [H, TI, C]  (pre-scaled by 1/sqrt(C))
    qe = qe_ref[...]                             # [H, TI, De] (q @ We_h^T, pre-scaled)
    k = k_ref[...]                               # [H, TJ, C]
    v = v_ref[...]                               # [H, TJ, C]
    ed = ed_ref[...].astype(f32)                 # [TI, TJ, De] (HBM stream is bf16)
    mask = (adj_ref[...].astype(jnp.int32) != 0)[None]   # [1, TI, TJ] (HBM stream int8)

    # s[h,i,j] = q_ih . k_jh + (q_ih @ We_h^T) . edense_ij   (1/sqrt(C) folded into q)
    s = jnp.einsum('hic,hjc->hij', q, k, preferred_element_type=f32)
    s = s + jnp.einsum('hie,ije->hij', qe, ed, preferred_element_type=f32)
    s = jnp.where(mask, s, f32(NEG_INF))

    # Online (flash-style) softmax over source-node tiles j.
    m_prev = m_scr[...]
    m_new = jnp.maximum(m_prev, jnp.max(s, axis=-1, keepdims=True))
    corr = jnp.exp(m_prev - m_new)
    p = jnp.exp(s - m_new)          # masked entries underflow to 0 for rows with edges
    l_scr[...] = corr * l_scr[...] + jnp.sum(p, axis=-1, keepdims=True)
    acc_scr[...] = corr * acc_scr[...] + jnp.einsum(
        'hij,hjc->hic', p, v, preferred_element_type=f32)
    racc_scr[...] = corr * racc_scr[...] + jnp.einsum(
        'hij,ije->hie', p, ed, preferred_element_type=f32)
    m_scr[...] = m_new

    @pl.when(j == nj - 1)
    def _finalize():
        # out_ih = (acc_ih + racc_ih @ We_h) / l_ih
        o = acc_scr[...] + jnp.einsum('hie,hce->hic', racc_scr[...], we_ref[...],
                                      preferred_element_type=f32)
        inv_l = pl.reciprocal(jnp.maximum(l_scr[...], f32(1e-30)), approx=True)
        o = o * inv_l                                            # [H, TI, C]
        attn = o.transpose(1, 0, 2).reshape(TI, H * C) + skip_ref[...]

        # LayerNorm over the feature dim (affine).
        mu = jnp.mean(attn, axis=-1, keepdims=True)
        var = jnp.mean((attn - mu) ** 2, axis=-1, keepdims=True)
        nrm = (attn - mu) * jax.lax.rsqrt(var + LN_EPS)
        nrm = nrm * gamma_ref[...] + beta_ref[...]

        # Final Linear(H*C -> C), ELU residual; lane-dense (TI//2, 128) slab store.
        lin = jnp.dot(nrm, wlin_ref[...], preferred_element_type=f32) + blin_ref[...]
        y = lin.reshape(out_ref.shape) + xres_ref[...]
        out_ref[...] = jnp.where(y > 0, y, jnp.expm1(jnp.minimum(y, 0.0)))


def unimp_block(x, edge_index, edge_attr, params, tile_i=128, tile_j=512):
    """Wrapper: densify the graph, hoist projections, run the tiled Pallas kernel."""
    N, D = x.shape
    De = edge_attr.shape[-1]
    H, C = HEADS, NODE_DIM
    src, tgt = edge_index[0], edge_index[1]

    # Dense adjacency (int8) / edge attrs (bf16) — toy scale; see CSR TODO above.
    adj = jnp.zeros((N, N), jnp.int32).at[tgt, src].set(1).astype(jnp.int8)
    edense = jnp.zeros((N, N, De), jnp.float32).at[tgt, src].set(
        edge_attr).astype(jnp.bfloat16)

    # Fold the 1/sqrt(C) attention scale into Wq/bq; single packed projection matmul.
    inv_sqrt_c = 1.0 / math.sqrt(C)
    w_all = jnp.concatenate([params['wq'] * inv_sqrt_c, params['wskip'],
                             params['wk'], params['wv']], axis=1)        # [64, 1024]
    b_all = jnp.concatenate([params['bq'] * inv_sqrt_c, params['bskip'],
                             params['bk'], params['bv']], axis=1)        # [1, 1024]

    proj = pl.pallas_call(
        proj_kernel,
        out_shape=jax.ShapeDtypeStruct((N, 4 * HC), jnp.float32),
    )(x, w_all, b_all)

    # One-time head-major relayouts (outside the grid loop).
    q_hm = proj[:, 0 * HC:1 * HC].reshape(N, H, C).transpose(1, 0, 2)    # [H, N, C]
    skip = proj[:, 1 * HC:2 * HC]                                        # [N, HC]
    k_hm = proj[:, 2 * HC:3 * HC].reshape(N, H, C).transpose(1, 0, 2)    # [H, N, C]
    v_hm = proj[:, 3 * HC:4 * HC].reshape(N, H, C).transpose(1, 0, 2)    # [H, N, C]
    we_hm = params['we'].reshape(De, H, C).transpose(1, 2, 0)            # [H, C, De]
    qe_hm = jnp.einsum('hnc,hce->hne', q_hm, we_hm)                      # [H, N, De]

    x_slab = x.reshape(N // 2, 2 * D)      # lane-dense residual / output layout

    TI = min(tile_i, N)
    TJ = min(tile_j, N)
    assert N % TI == 0 and N % TJ == 0 and TI % 16 == 0 and TJ % 8 == 0, \
        "toy wrapper: N must be divisible by a 16-aligned TI and an 8-aligned TJ"
    grid = (N // TI, N // TJ)

    in_specs = [
        pl.BlockSpec((TI // 2, 2 * D), lambda i, j: (i, 0)),      # x residual (slab)
        pl.BlockSpec((TI, HC), lambda i, j: (i, 0)),              # skip
        pl.BlockSpec((H, TI, C), lambda i, j: (0, i, 0)),         # q  (head-major)
        pl.BlockSpec((H, TI, De), lambda i, j: (0, i, 0)),        # qe (head-major)
        pl.BlockSpec((H, TJ, C), lambda i, j: (0, j, 0)),         # k  (head-major)
        pl.BlockSpec((H, TJ, C), lambda i, j: (0, j, 0)),         # v  (head-major)
        pl.BlockSpec((TI, TJ), lambda i, j: (i, j)),              # adj (int8)
        pl.BlockSpec((TI, TJ, De), lambda i, j: (i, j, 0)),       # edense (bf16)
        pl.BlockSpec((H, C, De), lambda i, j: (0, 0, 0)),         # We (head-major)
        pl.BlockSpec((1, HC), lambda i, j: (0, 0)),               # gamma
        pl.BlockSpec((1, HC), lambda i, j: (0, 0)),               # beta
        pl.BlockSpec((HC, D), lambda i, j: (0, 0)),               # wlin
        pl.BlockSpec((1, D), lambda i, j: (0, 0)),                # blin
    ]
    out_spec = pl.BlockSpec((TI // 2, 2 * D), lambda i, j: (i, 0))

    cost = pl.CostEstimate(
        flops=int(4 * H * N * N * (C + De) + 2 * N * D * 4 * HC + 2 * N * HC * D),
        transcendentals=int(H * N * N),
        bytes_accessed=int(N * N * (2 * De + 1)                 # edense bf16 + adj int8
                           + 4 * N * (4 * HC + HC + 2 * H * C + H * De)
                           + 4 * N * D * 2),
    )

    out2d = pl.pallas_call(
        unimp_attn_kernel,
        out_shape=jax.ShapeDtypeStruct((N // 2, 2 * D), jnp.float32),
        grid=grid,
        in_specs=in_specs,
        out_specs=out_spec,
        scratch_shapes=[
            pltpu.VMEM((H, TI, 1), jnp.float32),     # m  (running max)
            pltpu.VMEM((H, TI, 1), jnp.float32),     # l  (running denom)
            pltpu.VMEM((H, TI, C), jnp.float32),     # acc  (v path)
            pltpu.VMEM((H, TI, De), jnp.float32),    # racc (edge path)
        ],
        compiler_params=pltpu.CompilerParams(
            dimension_semantics=("parallel", "arbitrary"),
            # Above the default scoped limit so the TI=128/TJ=512 bf16 edense blocks
            # double-buffer; still under v7x's 64 MiB physical VMEM.  Raise toward
            # ~100 MiB on v5e/v6e for larger tiles (or pl.Buffered(3) on edense if the
            # DMA is still exposed).
            vmem_limit_bytes=48 * 1024 * 1024,
        ),
        cost_estimate=cost,
    )(x_slab, skip, q_hm, qe_hm, k_hm, v_hm, adj, edense, we_hm,
      params['gamma'], params['beta'], params['wlin'], params['blin'])

    out = out2d.reshape(N, D)
    # Mirror of PyG `Data(x=out, edge_index=e_idx, edge_attr=e_attr)`.
    return out, edge_index, edge_attr


def reference(x, edge_index, edge_attr, params):
    """Pure-JAX edge-list reference (PyG TransformerConv semantics) for validation."""
    N, D = x.shape
    H, C = HEADS, NODE_DIM
    src, tgt = edge_index[0], edge_index[1]
    q = (x @ params['wq'] + params['bq']).reshape(N, H, C)
    k = (x @ params['wk'] + params['bk']).reshape(N, H, C)
    v = (x @ params['wv'] + params['bv']).reshape(N, H, C)
    skip = x @ params['wskip'] + params['bskip']
    ed = (edge_attr @ params['we']).reshape(-1, H, C)
    q_i = q[tgt]
    k_j = k[src] + ed
    v_j = v[src] + ed
    alpha = (q_i * k_j).sum(-1) / math.sqrt(C)                    # [E, H]
    amax = jax.ops.segment_max(alpha, tgt, num_segments=N)
    p = jnp.exp(alpha - amax[tgt])
    denom = jax.ops.segment_sum(p, tgt, num_segments=N)
    alpha = p / denom[tgt]
    aggr = jax.ops.segment_sum(v_j * alpha[:, :, None], tgt,
                               num_segments=N).reshape(N, H * C)
    out = aggr + skip
    mu = out.mean(-1, keepdims=True)
    var = ((out - mu) ** 2).mean(-1, keepdims=True)
    nrm = (out - mu) / jnp.sqrt(var + LN_EPS) * params['gamma'] + params['beta']
    lin = nrm @ params['wlin'] + params['blin']
    y = lin + x
    return jnp.where(y > 0, y, jnp.expm1(y))


def linear_init(key, fan_in, fan_out, bias=True):
    kw, kb = jax.random.split(key)
    bound = 1.0 / math.sqrt(fan_in)
    w = jax.random.uniform(kw, (fan_in, fan_out), jnp.float32, -bound, bound)
    if bias:
        b = jax.random.uniform(kb, (1, fan_out), jnp.float32, -bound, bound)
        return w, b
    return w, None


if __name__ == "__main__":
    key = jax.random.PRNGKey(0)
    keys = jax.random.split(key, 10)

    N = 16
    x = jax.random.normal(keys[0], (N, NODE_DIM), jnp.float32)

    # Deterministic simple graph: node i receives edges from (i+1, i+2, i+3) mod N.
    tgt = jnp.repeat(jnp.arange(N), 3)
    src = (tgt + jnp.tile(jnp.array([1, 2, 3]), N)) % N
    edge_index = jnp.stack([src, tgt], axis=0).astype(jnp.int32)      # [2, E]
    E = edge_index.shape[1]
    edge_attr = jax.random.normal(keys[1], (E, EDGE_DIM), jnp.float32)

    wq, bq = linear_init(keys[2], NODE_DIM, HC)
    wk, bk = linear_init(keys[3], NODE_DIM, HC)
    wv, bv = linear_init(keys[4], NODE_DIM, HC)
    we, _ = linear_init(keys[5], EDGE_DIM, HC, bias=False)
    wskip, bskip = linear_init(keys[6], NODE_DIM, HC)
    wlin, blin = linear_init(keys[7], HC, NODE_DIM)
    params = dict(wq=wq, bq=bq, wk=wk, bk=bk, wv=wv, bv=bv, we=we,
                  wskip=wskip, bskip=bskip,
                  gamma=jnp.ones((1, HC), jnp.float32),
                  beta=jnp.zeros((1, HC), jnp.float32),
                  wlin=wlin, blin=blin)

    out, _, _ = unimp_block(x, edge_index, edge_attr, params)
    out = jax.block_until_ready(out)

    # The kernel streams edense as bf16, so validate against the reference on the same
    # quantized edge features (isolates kernel correctness from the quantization).
    edge_attr_q = edge_attr.astype(jnp.bfloat16).astype(jnp.float32)
    ref = reference(x, edge_index, edge_attr_q, params)
    err = float(jnp.max(jnp.abs(out - ref)))
    # 2e-3 tolerance: dominated by pl.reciprocal(approx=True); exact division meets 2e-4.
    assert jnp.allclose(out, ref, atol=2e-3, rtol=2e-3), f"max abs err {err}"
    print("KERNEL_OK")
</pallas_src>

<mosaic_0001>
module attributes {stable_mosaic.version = 11 : i64} {
  func.func @proj_kernel(%arg0: memref<16x64xf32, #tpu.memory_space<vmem>>, %arg1: memref<64x1024xf32, #tpu.memory_space<vmem>>, %arg2: memref<1x1024xf32, #tpu.memory_space<vmem>>, %arg3: memref<16x1024xf32, #tpu.memory_space<vmem>>) attributes {dimension_semantics = [], scalar_prefetch = 0 : i64, scratch_operands = 0 : i64, tpu.core_type = #tpu.core_type<tc>} {
    %c0 = arith.constant 0 : index
    %c0_0 = arith.constant 0 : index
    %0 = vector.load %arg0[%c0, %c0_0] : memref<16x64xf32, #tpu.memory_space<vmem>>, vector<16x64xf32>
    %c0_1 = arith.constant 0 : index
    %c0_2 = arith.constant 0 : index
    %1 = vector.load %arg1[%c0_1, %c0_2] : memref<64x1024xf32, #tpu.memory_space<vmem>>, vector<64x1024xf32>
    %cst = arith.constant dense<0.000000e+00> : vector<16x1024xf32>
    %2 = tpu.matmul %0, %1, %cst {dimension_numbers = #tpu.dot_dimension_numbers<[1], [0], [0], [1], [0, 0, 1, 1], [], []>} : vector<16x64xf32>, vector<64x1024xf32>, vector<16x1024xf32> -> vector<16x1024xf32>
    %c0_3 = arith.constant 0 : index
    %c0_4 = arith.constant 0 : index
    %3 = vector.load %arg2[%c0_3, %c0_4] : memref<1x1024xf32, #tpu.memory_space<vmem>>, vector<1x1024xf32>
    %4 = vector.broadcast %3 : vector<1x1024xf32> to vector<16x1024xf32>
    %5 = arith.addf %2, %4 : vector<16x1024xf32>
    %c0_5 = arith.constant 0 : index
    %c0_6 = arith.constant 0 : index
    %6 = vector.load %arg3[%c0_5, %c0_6] : memref<16x1024xf32, #tpu.memory_space<vmem>>, vector<16x1024xf32>
    tpu.vector_store %arg3[%c0_5, %c0_6], %5 {strides = array<i32>} : memref<16x1024xf32, #tpu.memory_space<vmem>>, vector<16x1024xf32>,
    return
  }
}

</mosaic_0001>

<bundles_post_ra>
// kernel: tpu_custom_call.1
= control target key start
LH: loop header
LB: loop body
LE: loop exit
PB: predicated region body
PF: predicated region fallthrough
CT: control target
= control target key end

     0   :  { %8 = vsyncpa [#allocation3], 0  ;;  %s791_s0 = inlined_call_operand.hbm [shape: f32[16,64], index: 0, kind: input, shape index: {}]   ;;  %s792_s1 = inlined_call_operand.hbm [shape: f32[64,1024], index: 1, kind: input, shape index: {}]   ;;  %s793_s2 = inlined_call_operand.hbm [shape: f32[1,1024], index: 2, kind: input, shape index: {}]   ;;  %s794_s3 = inlined_call_operand.hbm [shape: f32[16,1024], index: 3, kind: output, shape index: {}]  }
   0x1   :  { %9 = vsyncpa [#allocation6], 0 }
   0x2   :  { %10 = vsyncpa [#allocation4], 0  ;;  %s686_s12 = smov [#allocation5]   ;;  %s592_s16 = scalar_lea.hbm %s792_s1, 8192 }
   0x3   :  { %s28_s13 = sshll.u32 %s686_s12, 4  ;;  %p593_p0 = scmp.ne.s32.totalorder %s792_s1, %s592_s16  ;;  %s29_s13 = int_to_ptr.vmem [resolvable:$true] %s28_s13 }
   0x4   :  { %p596_p1 = scmp.lt.u32.totalorder %s592_s16, %s792_s1 }
   0x6   :  { %p598_p2 = pnand %p596_p1, %p593_p0 }
   0x8   :  { %601 = shalt.err (!%p598_p2)
}
   0x9   :  { %s602_s21 = scalar_lea.vmem %s29_s13, 8192  ;;  %p607_p4 = scmp.lt.s32.totalorder %s29_s13, %s29_s13 }
   0xa   :  { %p603_p3 = scmp.ne.s32.totalorder %s29_s13, %s602_s21  ;;  %p608_p5 = scmp.lt.s32.totalorder %s602_s21, %s602_s21 }
   0xc   :  { %p609_p6 = por %p608_p5, %p607_p4 }
   0xe   :  { %p610_p7 = pnand %p609_p6, %p603_p3 }
  0x10   :  { %613 = shalt.err (!%p610_p7)
}
  0x11   :  { %s687_s22 = smov 1024   ;;  %s688_s23 = smov 64  }
  0x12   :  { %34 = dma.hbm_to_vmem [thread:$0]  %s792_s1, 8192, %s29_s13, [#allocation6], %s687_s22, %s687_s22, %s688_s23  }
  0x13   :  { %s689_s26 = smov [#allocation2]   ;;  %s614_s30 = scalar_lea.hbm %s791_s0, 256 }
  0x14   :  { %s16_s27 = sshll.u32 %s689_s26, 4  ;;  %p615_p8 = scmp.ne.s32.totalorder %s791_s0, %s614_s30  ;;  %s17_s27 = int_to_ptr.vmem [resolvable:$true] %s16_s27 }
  0x15   :  { %p618_p9 = scmp.lt.u32.totalorder %s614_s30, %s791_s0 }
  0x17   :  { %p620_p10 = pnand %p618_p9, %p615_p8 }
  0x19   :  { %623 = shalt.err (!%p620_p10)
}
  0x1a   :  { %s624_s8 = scalar_lea.vmem %s17_s27, 256  ;;  %p629_p12 = scmp.lt.s32.totalorder %s17_s27, %s17_s27 }
  0x1b   :  { %p625_p11 = scmp.ne.s32.totalorder %s17_s27, %s624_s8  ;;  %p630_p13 = scmp.lt.s32.totalorder %s624_s8, %s624_s8 }
  0x1d   :  { %p631_p0 = por %p630_p13, %p629_p12 }
  0x1f   :  { %p632_p1 = pnand %p631_p0, %p625_p11 }
  0x21   :  { %635 = shalt.err (!%p632_p1)
}
  0x22   :  { %s690_s1 = smov 128   ;;  %s691_s9 = smov 8  }
  0x23   :  { %22 = dma.hbm_to_vmem [thread:$0]  %s791_s0, 256, %s17_s27, [#allocation3], %s690_s1, %s690_s1, %s691_s9  }
  0x24   :  { %s692_s12 = smov [#allocation7]   ;;  %s636_s16 = scalar_lea.hbm %s793_s2, 128 }
  0x25   :  { %s41_s13 = sshll.u32 %s692_s12, 4  ;;  %p637_p2 = scmp.ne.s32.totalorder %s793_s2, %s636_s16  ;;  %s42_s13 = int_to_ptr.vmem [resolvable:$true] %s41_s13 }
  0x26   :  { %p640_p3 = scmp.lt.u32.totalorder %s636_s16, %s793_s2 }
  0x28   :  { %p642_p4 = pnand %p640_p3, %p637_p2 }
  0x2a   :  { %645 = shalt.err (!%p642_p4)
}
  0x2b   :  { %s646_s21 = scalar_lea.vmem %s42_s13, 128  ;;  %p651_p6 = scmp.lt.s32.totalorder %s42_s13, %s42_s13 }
  0x2c   :  { %p647_p5 = scmp.ne.s32.totalorder %s42_s13, %s646_s21  ;;  %p652_p7 = scmp.lt.s32.totalorder %s646_s21, %s646_s21 }
  0x2e   :  { %p653_p8 = por %p652_p7, %p651_p6 }
  0x30   :  { %p654_p9 = pnand %p653_p8, %p647_p5 }
  0x32   :  { %657 = shalt.err (!%p654_p9)
}
  0x33   :  { %44 = dma.hbm_to_vmem [thread:$0]  %s793_s2, 128, %s42_s13, [#allocation6]  }
  0x34   :  { %680 = dma.done.wait [#allocation3], 256  }
  0x35   :  { %681 = vsyncadd [#allocation3], 4294967040 }
  0x36   :  { %682 = dma.done.wait [#allocation6], 8320  }
  0x37   :  { %683 = vsyncadd [#allocation6], 4294958976  ;;  %v693_v0 = vmov 0.0   ;;  %v57_v1 = vld [vmem:[#allocation5 + $0x8] sm:$0xff]  ;;  %v59_v3 = vld [vmem:[#allocation5 + $0x18] sm:$0xff]  ;;  %vm162_vm0 = vcmask 523264  }
  0x38   :  { %233 = vmatprep.mubr.f32.mxu0 %v693_v0  ;;  %310 = vmatprep.mubr.f32.mxu1 %v693_v0  ;;  %v65_v2 = vld [vmem:[#allocation5 + $0x48] sm:$0xff]  ;;  %v67_v5 = vld [vmem:[#allocation5 + $0x58] sm:$0xff]  ;;  %v56_v6 = vld [vmem:[#allocation5] sm:$0xff]  ;;  %s694_s2 = smov [#allocation8]  }
  0x39   :  { %v519_v4 = vpack.c.bf16 %v65_v2, %v57_v1  ;;  %v64_v7 = vld [vmem:[#allocation5 + $0x40] sm:$0xff]  ;;  %v535_v8 = vpack.c.bf16 %v67_v5, %v59_v3  ;;  %v58_v10 = vld [vmem:[#allocation5 + $0x10] sm:$0xff]  ;;  %v73_v12 = vld [vmem:[#allocation5 + $0x88] sm:$0xff]  ;;  %s498_s25 = sshll.u32 %s694_s2, 4  ;;  %s499_s25 = int_to_ptr.vmem [resolvable:$true] %s498_s25 }
  0x3a   :  { %v521_v9 = vpack.c.bf16 %v64_v7, %v56_v6  ;;  %v66_v11 = vld [vmem:[#allocation5 + $0x50] sm:$0xff]  ;;  %v81_v14 = vld [vmem:[#allocation5 + $0xc8] sm:$0xff]  ;;  %v75_v15 = vld [vmem:[#allocation5 + $0x98] sm:$0xff]  ;;  %s658_s26 = scalar_lea.vmem %s499_s25, 2048  ;;  %p663_p11 = scmp.lt.s32.totalorder %s499_s25, %s499_s25 }
  0x3b   :  { %520 = vmatprep.subr.bf16.mxu0 %v519_v4  ;;  %v537_v13 = vpack.c.bf16 %v66_v11, %v58_v10  ;;  %v83_v16 = vld [vmem:[#allocation5 + $0xd8] sm:$0xff]  ;;  %536 = vmatprep.subr.bf16.mxu1 %v535_v8  ;;  %v523_v17 = vpack.c.bf16 %v81_v14, %v73_v12  ;;  %v72_v19 = vld [vmem:[#allocation5 + $0x80] sm:$0xff]  ;;  %v74_v21 = vld [vmem:[#allocation5 + $0x90] sm:$0xff]  ;;  %p659_p10 = scmp.ne.s32.totalorder %s499_s25, %s658_s26  ;;  %p664_p12 = scmp.lt.s32.totalorder %s658_s26, %s658_s26 }
  0x3c   :  { %522 = vmatpush1.bf16.msra.mxu0 %v521_v9  ;;  %v539_v18 = vpack.c.bf16 %v83_v16, %v75_v15  ;;  %v80_v20 = vld [vmem:[#allocation5 + $0xc0] sm:$0xff]  ;;  %v82_v23 = vld [vmem:[#allocation5 + $0xd0] sm:$0xff]  ;;  %v89_v24 = vld [vmem:[#allocation5 + $0x108] sm:$0xff] }
  0x3d   :  { %538 = vmatpush1.bf16.msra.mxu1 %v537_v13  ;;  %v525_v22 = vpack.c.bf16 %v80_v20, %v72_v19  ;;  %v97_v25 = vld [vmem:[#allocation5 + $0x148] sm:$0xff]  ;;  %524 = vmatprep.subr.bf16.mxu0 %v523_v17  ;;  %v541_v26 = vpack.c.bf16 %v82_v23, %v74_v21  ;;  %v91_v28 = vld [vmem:[#allocation5 + $0x118] sm:$0xff]  ;;  %v88_v30 = vld [vmem:[#allocation5 + $0x100] sm:$0xff]  ;;  %p665_p13 = por %p664_p12, %p663_p11 }
  0x3e   :  { %540 = vmatprep.subr.bf16.mxu1 %v539_v18  ;;  %v527_v27 = vpack.c.bf16 %v97_v25, %v89_v24  ;;  %v99_v29 = vld [vmem:[#allocation5 + $0x158] sm:$0xff]  ;;  %v96_v32 = vld [vmem:[#allocation5 + $0x140] sm:$0xff]  ;;  %v90_v33 = vld [vmem:[#allocation5 + $0x110] sm:$0xff] }
  0x3f   :  { %v543_v31 = vpack.c.bf16 %v99_v29, %v91_v28  ;;  %v98_v34 = vld [vmem:[#allocation5 + $0x150] sm:$0xff]  ;;  %v529_v35 = vpack.c.bf16 %v96_v32, %v88_v30  ;;  %v105_v36 = vld [vmem:[#allocation5 + $0x188] sm:$0xff]  ;;  %v107_v38 = vld [vmem:[#allocation5 + $0x198] sm:$0xff]  ;;  %p666_p0 = pnand %p665_p13, %p659_p10 }
  0x40   :  { %526 = vmatpush1.bf16.msra.mxu0 %v525_v22  ;;  %v113_v37 = vld [vmem:[#allocation5 + $0x1c8] sm:$0xff]  ;;  %v545_v39 = vpack.c.bf16 %v98_v34, %v90_v33  ;;  %v115_v41 = vld [vmem:[#allocation5 + $0x1d8] sm:$0xff]  ;;  %v104_v42 = vld [vmem:[#allocation5 + $0x180] sm:$0xff] }
  0x41   :  { %542 = vmatpush1.bf16.msra.mxu1 %v541_v26  ;;  %528 = vmatprep.subr.bf16.mxu0 %v527_v27  ;;  %v531_v40 = vpack.c.bf16 %v113_v37, %v105_v36  ;;  %v112_v43 = vld [vmem:[#allocation5 + $0x1c0] sm:$0xff]  ;;  %v547_v44 = vpack.c.bf16 %v115_v41, %v107_v38  ;;  %v106_v45 = vld [vmem:[#allocation5 + $0x190] sm:$0xff]  ;;  %v61_v47 = vld [vmem:[#allocation5 + $0x28] sm:$0xff]  ;;  %v122_v36 = vlaneseq }
  0x42   :  { %544 = vmatprep.subr.bf16.mxu1 %v543_v31  ;;  %v114_v46 = vld [vmem:[#allocation5 + $0x1d0] sm:$0xff]  ;;  %v69_v48 = vld [vmem:[#allocation5 + $0x68] sm:$0xff]  ;;  %v63_v49 = vld [vmem:[#allocation5 + $0x38] sm:$0xff]  ;;  %v533_v50 = vpack.c.bf16 %v112_v43, %v104_v42 }
  0x43   :  { %v71_v51 = vld [vmem:[#allocation5 + $0x78] sm:$0xff]  ;;  %v549_v52 = vpack.c.bf16 %v114_v46, %v106_v45  ;;  %v551_v53 = vpack.c.bf16 %v69_v48, %v61_v47  ;;  %v60_v54 = vld [vmem:[#allocation5 + $0x20] sm:$0xff]  ;;  %v62_v56 = vld [vmem:[#allocation5 + $0x30] sm:$0xff]  ;;  %v123_v37 = vshrl.u32 %v122_v36, 7 }
  0x44   :  { %530 = vmatpush1.bf16.msra.mxu0 %v529_v35  ;;  %v68_v55 = vld [vmem:[#allocation5 + $0x60] sm:$0xff]  ;;  %v567_v57 = vpack.c.bf16 %v71_v51, %v63_v49  ;;  %v70_v58 = vld [vmem:[#allocation5 + $0x70] sm:$0xff]  ;;  %v77_v59 = vld [vmem:[#allocation5 + $0xa8] sm:$0xff] }
  0x45   :  { %546 = vmatpush1.bf16.msra.mxu1 %v545_v39  ;;  %532 = vmatprep.subr.bf16.mxu0 %v531_v40  ;;  %v85_v60 = vld [vmem:[#allocation5 + $0xe8] sm:$0xff]  ;;  %v79_v61 = vld [vmem:[#allocation5 + $0xb8] sm:$0xff]  ;;  %v756_v63 = vld [vmem:[#allocation2] sm:$0xff]  ;;  %v553_v1 = vpack.c.bf16 %v68_v55, %v60_v54  ;;  %v569_v2 = vpack.c.bf16 %v70_v58, %v62_v56  ;;  %v124_v38 = vsub.s32 0, %v123_v37  ;;  %v132_v40 = vsub.s32 2, %v123_v37 }
  0x46   :  { %548 = vmatprep.subr.bf16.mxu1 %v547_v44  ;;  %v87_v62 = vld [vmem:[#allocation5 + $0xf8] sm:$0xff]  ;;  %v555_v3 = vpack.c.bf16 %v85_v60, %v77_v59  ;;  %v76_v4 = vld [vmem:[#allocation5 + $0xa0] sm:$0xff]  ;;  %v78_v6 = vld [vmem:[#allocation5 + $0xb0] sm:$0xff]  ;;  %v128_v41 = vsub.s32 1, %v123_v37  ;;  %v136_v42 = vsub.s32 3, %v123_v37 }
  0x47   :  { %v84_v5 = vld [vmem:[#allocation5 + $0xe0] sm:$0xff]  ;;  %v571_v7 = vpack.c.bf16 %v87_v62, %v79_v61  ;;  %v86_v8 = vld [vmem:[#allocation5 + $0xf0] sm:$0xff]  ;;  %v93_v9 = vld [vmem:[#allocation5 + $0x128] sm:$0xff]  ;;  %v140_v62 = vsub.s32 4, %v123_v37 }
  0x48   :  { %534 = vmatpush1.bf16.msra.mxu0 %v533_v50  ;;  %v101_v10 = vld [vmem:[#allocation5 + $0x168] sm:$0xff]  ;;  %v95_v11 = vld [vmem:[#allocation5 + $0x138] sm:$0xff]  ;;  %v557_v13 = vpack.c.bf16 %v84_v5, %v76_v4  ;;  %v573_v15 = vpack.c.bf16 %v86_v8, %v78_v6  ;;  %v92_v17 = vld [vmem:[#allocation5 + $0x120] sm:$0xff] }
  0x49   :  { %550 = vmatpush1.bf16.msra.mxu1 %v549_v52  ;;  %552 = vmatprep.subr.bf16.mxu0 %v551_v53  ;;  %v103_v12 = vld [vmem:[#allocation5 + $0x178] sm:$0xff]  ;;  %v559_v16 = vpack.c.bf16 %v101_v10, %v93_v9  ;;  %v100_v18 = vld [vmem:[#allocation5 + $0x160] sm:$0xff]  ;;  %v94_v19 = vld [vmem:[#allocation5 + $0x130] sm:$0xff] }
  0x4a   :  { %568 = vmatprep.subr.bf16.mxu1 %v567_v57  ;;  %v55_v14 = vld [vmem:[#allocation2 + $0x8] sm:$0xff]  ;;  %v575_v20 = vpack.c.bf16 %v103_v12, %v95_v11  ;;  %v102_v21 = vld [vmem:[#allocation5 + $0x170] sm:$0xff]  ;;  %v109_v22 = vld [vmem:[#allocation5 + $0x1a8] sm:$0xff]  ;;  %v561_v26 = vpack.c.bf16 %v100_v18, %v92_v17 }
  0x4b   :  { %511 = vmatmul.mubr.msk.f32.vlgmr.msra.gmra.mrb[0].mxu0 %vm162_vm0, %v756_v63  ;;  %v117_v23 = vld [vmem:[#allocation5 + $0x1e8] sm:$0xff]  ;;  %v111_v24 = vld [vmem:[#allocation5 + $0x1b8] sm:$0xff]  ;;  %v577_v27 = vpack.c.bf16 %v102_v21, %v94_v19  ;;  %v108_v29 = vld [vmem:[#allocation5 + $0x1a0] sm:$0xff] }
  0x4c   :  { %513 = vmatmul.mubr.msk.f32.vlgmr.msra.gmra.mrb[0].mxu1 %vm162_vm0, %v756_v63  ;;  %554 = vmatpush1.bf16.msra.mxu0 %v553_v1  ;;  %v119_v25 = vld [vmem:[#allocation5 + $0x1f8] sm:$0xff]  ;;  %v563_v28 = vpack.c.bf16 %v117_v23, %v109_v22  ;;  %v116_v30 = vld [vmem:[#allocation5 + $0x1e0] sm:$0xff]  ;;  %v110_v32 = vld [vmem:[#allocation5 + $0x1b0] sm:$0xff]  ;;  %v144_v1 = vsub.s32 5, %v123_v37 }
  0x4d   :  { %570 = vmatpush1.bf16.msra.mxu1 %v569_v2  ;;  %556 = vmatprep.subr.bf16.mxu0 %v555_v3  ;;  %v579_v31 = vpack.c.bf16 %v119_v25, %v111_v24  ;;  %v118_v33 = vld [vmem:[#allocation5 + $0x1f0] sm:$0xff]  ;;  %v565_v34 = vpack.c.bf16 %v116_v30, %v108_v29  ;;  %v120_v39 = vld [vmem:[#allocation7] sm:$0xff]  ;;  %v152_v2 = vsub.s32 7, %v123_v37 }
  0x4e   :  { %572 = vmatprep.subr.bf16.mxu1 %v571_v7  ;;  %239 = vmatprep.mubr.f32.mxu0 %v693_v0  ;;  %v581_v35 = vpack.c.bf16 %v118_v33, %v110_v32  ;;  %v125_v43 = vrot.slane %v120_v39, %v124_v38  ;;  %v133_v44 = vrot.slane %v120_v39, %v132_v40 }
  0x4f   :  { %316 = vmatprep.mubr.f32.mxu1 %v693_v0  ;;  %512 = vmatmul.mubr.msk.f32.gmra.mrb[2].mxu0 %vm162_vm0, %v55_v14  ;;  %v129_v45 = vrot.slane %v120_v39, %v128_v41  ;;  %v137_v46 = vrot.slane %v120_v39, %v136_v42  ;;  %v141_v3 = vrot.slane %v120_v39, %v140_v62 }
  0x50   :  { %558 = vmatpush1.bf16.msra.mxu0 %v557_v13  ;;  %514 = vmatmul.mubr.msk.f32.gmra.mrb[2].mxu1 %vm162_vm0, %v55_v14  ;;  %v145_v5 = vrot.slane %v120_v39, %v144_v1  ;;  %v153_v6 = vrot.slane %v120_v39, %v152_v2 }
  0x51   :  { %574 = vmatpush1.bf16.msra.mxu1 %v573_v15  ;;  %560 = vmatprep.subr.bf16.mxu0 %v559_v16 }
  0x52   :  { %576 = vmatprep.subr.bf16.mxu1 %v575_v20  ;;  %387 = vmatprep.mubr.f32.mxu0 %v693_v0 }
  0x53   :  { %464 = vmatprep.mubr.f32.mxu1 %v693_v0 }
  0x54   :  { %562 = vmatpush1.bf16.msra.mxu0 %v561_v26 }
  0x55   :  { %578 = vmatpush1.bf16.msra.mxu1 %v577_v27  ;;  %564 = vmatprep.subr.bf16.mxu0 %v563_v28 }
  0x56   :  { %580 = vmatprep.subr.bf16.mxu1 %v579_v31 }
  0x58   :  { %566 = vmatpush1.bf16.msra.mxu0 %v565_v34 }
  0x59   :  { %582 = vmatpush1.bf16.msra.mxu1 %v581_v35 }
  0x5b   :  { %515 = vmatmul.mubr.msk.f32.vlgmr.msra.gmra.mrb[4].mxu0 %vm162_vm0, %v756_v63 }
  0x5c   :  { %517 = vmatmul.mubr.msk.f32.vlgmr.msra.gmra.mrb[4].mxu1 %vm162_vm0, %v756_v63  ;;  %393 = vmatprep.mubr.f32.mxu0 %v693_v0  ;;  %v148_v63 = vsub.s32 6, %v123_v37 }
  0x5d   :  { %470 = vmatprep.mubr.f32.mxu1 %v693_v0 }
  0x5e   :  { %v149_v4 = vrot.slane %v120_v39, %v148_v63 }
  0x5f   :  { %516 = vmatmul.mubr.msk.f32.gmra.mrb[6].mxu0 %vm162_vm0, %v55_v14 }
  0x60   :  { %518 = vmatmul.mubr.msk.f32.gmra.mrb[6].mxu1 %vm162_vm0, %v55_v14 }
 0x11e   :  { %v235_v47 = vpop.f32.mrb[0].mxu0 }
 0x11f   :  { %v236_v48 = vadd.f32 %v235_v47, %v125_v43  ;;  %v312_v49 = vpop.f32.mrb[0].mxu1  ;;  %v237_v50 = vpop.f32.mrb[1].mxu0 }
 0x120   :  { %v313_v0 = vadd.f32 %v312_v49, %v133_v44  ;;  %v238_v51 = vadd.f32 %v237_v50, %v129_v45  ;;  %v314_v52 = vpop.f32.mrb[1].mxu1 }
 0x121   :  { %477 = vst [vmem:[#allocation8] sm:$0xff] %v236_v48  ;;  %v315_v53 = vadd.f32 %v314_v52, %v137_v46 }
 0x122   :  { %479 = vst [vmem:[#allocation8 + $0x10] sm:$0xff] %v313_v0  ;;  %478 = vst [vmem:[#allocation8 + $0x8] sm:$0xff] %v238_v51  ;;  %v241_v54 = vpop.f32.mrb[2].mxu0 }
 0x123   :  { %480 = vst [vmem:[#allocation8 + $0x18] sm:$0xff] %v315_v53  ;;  %v242_v55 = vadd.f32 %v241_v54, %v125_v43  ;;  %v318_v56 = vpop.f32.mrb[2].mxu1  ;;  %v243_v57 = vpop.f32.mrb[3].mxu0 }
 0x124   :  { %v319_v58 = vadd.f32 %v318_v56, %v133_v44  ;;  %v244_v59 = vadd.f32 %v243_v57, %v129_v45  ;;  %v320_v60 = vpop.f32.mrb[3].mxu1 }
 0x125   :  { %485 = vst [vmem:[#allocation8 + $0x40] sm:$0xff] %v242_v55  ;;  %v321_v61 = vadd.f32 %v320_v60, %v137_v46 }
 0x126   :  { %487 = vst [vmem:[#allocation8 + $0x50] sm:$0xff] %v319_v58  ;;  %486 = vst [vmem:[#allocation8 + $0x48] sm:$0xff] %v244_v59 }
 0x127   :  { %488 = vst [vmem:[#allocation8 + $0x58] sm:$0xff] %v321_v61 }
 0x12e   :  { %v389_v7 = vpop.f32.mrb[4].mxu0 }
 0x12f   :  { %v390_v8 = vadd.f32 %v389_v7, %v141_v3  ;;  %v466_v9 = vpop.f32.mrb[4].mxu1  ;;  %v391_v10 = vpop.f32.mrb[5].mxu0 }
 0x130   :  { %v467_v11 = vadd.f32 %v466_v9, %v149_v4  ;;  %v392_v12 = vadd.f32 %v391_v10, %v145_v5  ;;  %v468_v13 = vpop.f32.mrb[5].mxu1 }
 0x131   :  { %481 = vst [vmem:[#allocation8 + $0x20] sm:$0xff] %v390_v8  ;;  %v469_v14 = vadd.f32 %v468_v13, %v153_v6 }
 0x132   :  { %483 = vst [vmem:[#allocation8 + $0x30] sm:$0xff] %v467_v11  ;;  %482 = vst [vmem:[#allocation8 + $0x28] sm:$0xff] %v392_v12  ;;  %v395_v15 = vpop.f32.mrb[6].mxu0 }
 0x133   :  { %484 = vst [vmem:[#allocation8 + $0x38] sm:$0xff] %v469_v14  ;;  %v396_v16 = vadd.f32 %v395_v15, %v141_v3  ;;  %v472_v17 = vpop.f32.mrb[6].mxu1  ;;  %v397_v18 = vpop.f32.mrb[7].mxu0 }
 0x134   :  { %v473_v19 = vadd.f32 %v472_v17, %v149_v4  ;;  %v398_v20 = vadd.f32 %v397_v18, %v145_v5  ;;  %v474_v21 = vpop.f32.mrb[7].mxu1 }
 0x135   :  { %489 = vst [vmem:[#allocation8 + $0x60] sm:$0xff] %v396_v16  ;;  %v475_v22 = vadd.f32 %v474_v21, %v153_v6 }
 0x136   :  { %491 = vst [vmem:[#allocation8 + $0x70] sm:$0xff] %v473_v19  ;;  %490 = vst [vmem:[#allocation8 + $0x68] sm:$0xff] %v398_v20 }
 0x137   :  { %492 = vst [vmem:[#allocation8 + $0x78] sm:$0xff] %v475_v22 }
 0x138   :  { %669 = shalt.err (!%p666_p0)
}
 0x139   :  { %s670_s29 = scalar_lea.hbm %s794_s3, 2048 }
 0x13a   :  { %p671_p1 = scmp.ne.s32.totalorder %s794_s3, %s670_s29  ;;  %p674_p2 = scmp.lt.u32.totalorder %s670_s29, %s794_s3 }
 0x13c   :  { %p676_p3 = pnand %p674_p2, %p671_p1 }
 0x13e   :  { %679 = shalt.err (!%p676_p3)
}
 0x13f   :  { %504 = dma.vmem_to_hbm [thread:$0]  %s499_s25, 2048, %s794_s3, [#allocation4], %s687_s22, %s687_s22, %s688_s23  }
 0x140   :  { %684 = dma.done.wait [#allocation4], 2048  }
 0x141   :  { %685 = vsyncadd [#allocation4], 4294965248 }
 0x142   :  { %508 = vsyncpa [#allocation3], 1 }
 0x143   :  { %509 = vsyncpa [#allocation6], 1 }
 0x144   :  { %510 = vsyncpa [#allocation4], 1 }

</bundles_post_ra>
